<compile_context>
chip_gen: v6e
topology: v6e:2x2x1
jax: 0.10.0
libtpu: 0.0.40
codegen_flags: <defaults>
</compile_context>

<pallas_src>
import math

import jax
import jax.numpy as jnp
from jax.experimental import pallas as pl
from jax.experimental.pallas import tpu as pltpu


def lstm_fc_kernel(x_ref, wx_ref, wh_ref, b_ref,
                   w1_ref, b1_ref, w2_ref, b2_ref, out_ref):
    T, B, I = x_ref.shape          # time-major input
    H = wh_ref.shape[0]
    H4 = 4 * H

    # ---- Hoisted input projection (+ combined bias) for all timesteps:
    # one (T*B, I) @ (I, 4H) matmul.  x is time-major, so the reshape is
    # layout-preserving and gx[t] below is a contiguous (B, 4H) slab.
    x_flat = x_ref[...].reshape(T * B, I)
    gx = jnp.dot(x_flat, wx_ref[...], preferred_element_type=jnp.float32)
    gx = (gx + b_ref[...]).reshape(T, B, H4)

    wh = wh_ref[...]
    h = jnp.zeros((B, H), jnp.float32)
    c = jnp.zeros((B, H), jnp.float32)

    # ---- Fully unrolled recurrence.  Per step on the serial chain:
    #   1 MXU matmul (h @ Wh) + 1 full-width tanh (EUP) + VALU fix-ups + tanh(c).
    # The i/f/o columns of wx/wh/b were pre-scaled by 0.5 in
    # prepare_kernel_params, so sigmoid(z) == 0.5*tanh(z/2) + 0.5 and the
    # single tanh below covers all four gates.
    for t in range(T):
        gates = gx[t] + jnp.dot(h, wh, preferred_element_type=jnp.float32)  # (B, 4H)
        tg = jnp.tanh(gates)                     # one EUP push for i, f, g, o
        if_g = 0.5 * tg[:, 0:2 * H] + 0.5        # sigmoid(i), sigmoid(f)
        g_g = tg[:, 2 * H:3 * H]                 # tanh(g)  (columns not pre-scaled)
        o_g = 0.5 * tg[:, 3 * H:4 * H] + 0.5     # sigmoid(o)
        c = if_g[:, H:2 * H] * c + if_g[:, 0:H] * g_g
        h = o_g * jnp.tanh(c)                    # h after step T-1 == out[:, -1, :]

    # ---- FC head: Linear(H, 32) -> ReLU -> Linear(32, 1).
    hid = jnp.dot(h, w1_ref[...], preferred_element_type=jnp.float32) + b1_ref[...]
    hid = jnp.maximum(hid, 0.0)
    # 1-wide output matmul as VPU multiply + lane reduction (w2 is a (1,32) row);
    # (B,1) masked store is fine — do not lane-densify it.
    out_ref[...] = jnp.sum(hid * w2_ref[...], axis=-1, keepdims=True) + b2_ref[...]


def lstm_aqi_forward(x, kernel_params):
    """x: (B, T, I) batch_first, matching the PyTorch module. Returns (B, 1).

    kernel_params must come from prepare_kernel_params (i/f/o columns pre-scaled).
    """
    wx, wh, b, w1, b1, w2, b2 = kernel_params
    B, T, I = x.shape
    H = wh.shape[0]

    # Time-major layout plumbing (512 B): keeps every per-step gx slice
    # contiguous inside the kernel; fuses away under jit in real use.
    x_tm = jnp.transpose(x.astype(jnp.float32), (1, 0, 2))   # (T, B, I)

    # Advisory cost estimate: latency-bound, not BW/VMEM-bound.
    flops = 2 * B * T * 4 * H * (I + H) + 2 * B * H * 32 + 2 * B * 32
    transcendentals = B * T * 5 * H          # one (B,4H) tanh + one (B,H) tanh per step
    bytes_accessed = 4 * (x.size + wx.size + wh.size + b.size
                          + w1.size + b1.size + w2.size + b2.size + B)

    vmem = pl.BlockSpec(memory_space=pltpu.MemorySpace.VMEM)
    # NOTE: sequences up to B=8 pack into the unused f32 sublanes at ~identical
    # per-step latency.  Only for B in the hundreds add a grid over B with
    # dimension_semantics=("parallel",) so v7x's two TensorCores split the batch;
    # on v5e/v6e (1 TC) that grid is pure ~0.35 us/step overhead until then.
    return pl.pallas_call(
        lstm_fc_kernel,
        out_shape=jax.ShapeDtypeStruct((B, 1), jnp.float32),
        in_specs=[vmem] * 8,
        out_specs=vmem,
        cost_estimate=pl.CostEstimate(
            flops=flops,
            transcendentals=transcendentals,
            bytes_accessed=bytes_accessed),
    )(x_tm, wx, wh, b, w1, b1, w2, b2)


def init_params(key, input_size, hidden_size):
    """Canonical params (kernel layout, UNscaled), mimicking PyTorch's uniform init.

    Layout: wx (I,4H), wh (H,4H), b (1,4H)=b_ih+b_hh with gate order [i,f,g,o];
    w1 (H,32), b1 (1,32), w2 (1,32) row, b2 (1,1).
    """
    ks = jax.random.split(key, 8)
    k_lstm = 1.0 / math.sqrt(hidden_size)
    w_ih = jax.random.uniform(ks[0], (4 * hidden_size, input_size), jnp.float32, -k_lstm, k_lstm)
    w_hh = jax.random.uniform(ks[1], (4 * hidden_size, hidden_size), jnp.float32, -k_lstm, k_lstm)
    b_ih = jax.random.uniform(ks[2], (4 * hidden_size,), jnp.float32, -k_lstm, k_lstm)
    b_hh = jax.random.uniform(ks[3], (4 * hidden_size,), jnp.float32, -k_lstm, k_lstm)

    k_fc1 = 1.0 / math.sqrt(hidden_size)
    fc1_w = jax.random.uniform(ks[4], (32, hidden_size), jnp.float32, -k_fc1, k_fc1)
    fc1_b = jax.random.uniform(ks[5], (32,), jnp.float32, -k_fc1, k_fc1)
    k_fc2 = 1.0 / math.sqrt(32)
    fc2_w = jax.random.uniform(ks[6], (1, 32), jnp.float32, -k_fc2, k_fc2)
    fc2_b = jax.random.uniform(ks[7], (1,), jnp.float32, -k_fc2, k_fc2)

    wx = w_ih.T                         # (I, 4H)
    wh = w_hh.T                         # (H, 4H)
    b = (b_ih + b_hh).reshape(1, -1)    # (1, 4H)
    w1 = fc1_w.T                        # (H, 32)
    b1 = fc1_b.reshape(1, -1)           # (1, 32)
    w2 = fc2_w                          # (1, 32)
    b2 = fc2_b.reshape(1, -1)           # (1, 1)
    return (wx, wh, b, w1, b1, w2, b2)


def prepare_kernel_params(params):
    """One-time weight prep for the single-tanh kernel.

    Scales the i, f, o gate columns of wx, wh and b by 0.5 so that inside the
    kernel sigmoid(z) == 0.5 * tanh(z/2) + 0.5 needs only one tanh over the
    full (B, 4H) gate vector.  The g columns stay full-scale.
    """
    wx, wh, b, w1, b1, w2, b2 = params
    H4 = b.shape[-1]
    H = H4 // 4
    col_scale = jnp.concatenate([
        jnp.full((2 * H,), 0.5, jnp.float32),   # i, f
        jnp.ones((H,), jnp.float32),            # g
        jnp.full((H,), 0.5, jnp.float32),       # o
    ])
    return (wx * col_scale, wh * col_scale, b * col_scale, w1, b1, w2, b2)


def reference_forward(x, params):
    """Pure-JAX reference of the PyTorch forward (uses the UNscaled params)."""
    wx, wh, b, w1, b1, w2, b2 = params
    B = x.shape[0]
    H = wh.shape[0]

    def cell(carry, x_t):
        h, c = carry
        gates = x_t @ wx + h @ wh + b
        i_g = jax.nn.sigmoid(gates[:, 0:H])
        f_g = jax.nn.sigmoid(gates[:, H:2 * H])
        g_g = jnp.tanh(gates[:, 2 * H:3 * H])
        o_g = jax.nn.sigmoid(gates[:, 3 * H:4 * H])
        c_new = f_g * c + i_g * g_g
        h_new = o_g * jnp.tanh(c_new)
        return (h_new, c_new), None

    x_tm = jnp.transpose(x, (1, 0, 2))
    (h_last, _), _ = jax.lax.scan(cell, (jnp.zeros((B, H)), jnp.zeros((B, H))), x_tm)
    hid = jnp.maximum(h_last @ w1 + b1, 0.0)
    return hid @ w2.T + b2


if __name__ == "__main__":
    # Small shapes consistent with the module: batch=2, seq=8, features=8, hidden=32.
    B, T, I, H = 2, 8, 8, 32

    key = jax.random.PRNGKey(0)
    k_x, k_p = jax.random.split(key)
    x = jax.random.normal(k_x, (B, T, I), jnp.float32)

    params = init_params(k_p, input_size=I, hidden_size=H)       # canonical layout
    kernel_params = prepare_kernel_params(params)                 # 0.5-scaled i/f/o cols

    out = lstm_aqi_forward(x, kernel_params)
    out = jax.block_until_ready(out)

    ref = reference_forward(x, params)
    assert out.shape == (B, 1), out.shape
    assert jnp.allclose(out, ref, atol=2e-4, rtol=2e-4), (out, ref)

    print("KERNEL_OK")
</pallas_src>

<mosaic_0001>
module attributes {stable_mosaic.version = 11 : i64} {
  func.func @lstm_fc_kernel(%arg0: memref<8x2x8xf32, #tpu.memory_space<vmem>>, %arg1: memref<8x128xf32, #tpu.memory_space<vmem>>, %arg2: memref<32x128xf32, #tpu.memory_space<vmem>>, %arg3: memref<1x128xf32, #tpu.memory_space<vmem>>, %arg4: memref<32x32xf32, #tpu.memory_space<vmem>>, %arg5: memref<1x32xf32, #tpu.memory_space<vmem>>, %arg6: memref<1x32xf32, #tpu.memory_space<vmem>>, %arg7: memref<1x1xf32, #tpu.memory_space<vmem>>, %arg8: memref<2x1xf32, #tpu.memory_space<vmem>>) attributes {dimension_semantics = [], scalar_prefetch = 0 : i64, scratch_operands = 0 : i64, tpu.core_type = #tpu.core_type<tc>} {
    %c0 = arith.constant 0 : index
    %c0_0 = arith.constant 0 : index
    %c0_1 = arith.constant 0 : index
    %0 = vector.load %arg0[%c0, %c0_0, %c0_1] : memref<8x2x8xf32, #tpu.memory_space<vmem>>, vector<8x2x8xf32>
    %1 = vector.shape_cast %0 : vector<8x2x8xf32> to vector<16x8xf32>
    %c0_2 = arith.constant 0 : index
    %c0_3 = arith.constant 0 : index
    %2 = vector.load %arg1[%c0_2, %c0_3] : memref<8x128xf32, #tpu.memory_space<vmem>>, vector<8x128xf32>
    %cst = arith.constant dense<0.000000e+00> : vector<16x128xf32>
    %3 = tpu.matmul %1, %2, %cst {dimension_numbers = #tpu.dot_dimension_numbers<[1], [0], [0], [1], [0, 0, 1, 1], [], []>} : vector<16x8xf32>, vector<8x128xf32>, vector<16x128xf32> -> vector<16x128xf32>
    %c0_4 = arith.constant 0 : index
    %c0_5 = arith.constant 0 : index
    %4 = vector.load %arg3[%c0_4, %c0_5] : memref<1x128xf32, #tpu.memory_space<vmem>>, vector<1x128xf32>
    %5 = vector.broadcast %4 : vector<1x128xf32> to vector<16x128xf32>
    %6 = arith.addf %3, %5 : vector<16x128xf32>
    %7 = vector.shape_cast %6 : vector<16x128xf32> to vector<8x2x128xf32>
    %c0_6 = arith.constant 0 : index
    %c0_7 = arith.constant 0 : index
    %8 = vector.load %arg2[%c0_6, %c0_7] : memref<32x128xf32, #tpu.memory_space<vmem>>, vector<32x128xf32>
    %cst_8 = arith.constant 0.000000e+00 : f32
    %9 = vector.broadcast %cst_8 : f32 to vector<2x32xf32>
    %cst_9 = arith.constant 0.000000e+00 : f32
    %10 = vector.broadcast %cst_9 : f32 to vector<2x32xf32>
    %11 = vector.extract_strided_slice %7 {offsets = [0, 0, 0], sizes = [1, 2, 128], strides = [1, 1, 1]} : vector<8x2x128xf32> to vector<1x2x128xf32>
    %12 = vector.shape_cast %11 : vector<1x2x128xf32> to vector<2x128xf32>
    %cst_10 = arith.constant dense<0.000000e+00> : vector<2x128xf32>
    %13 = tpu.matmul %9, %8, %cst_10 {dimension_numbers = #tpu.dot_dimension_numbers<[1], [0], [0], [1], [0, 0, 1, 1], [], []>} : vector<2x32xf32>, vector<32x128xf32>, vector<2x128xf32> -> vector<2x128xf32>
    %14 = arith.addf %12, %13 : vector<2x128xf32>
    %15 = math.tanh %14 : vector<2x128xf32>
    %16 = vector.extract_strided_slice %15 {offsets = [0, 0], sizes = [2, 64], strides = [1, 1]} : vector<2x128xf32> to vector<2x64xf32>
    %cst_11 = arith.constant 5.000000e-01 : f32
    %17 = vector.broadcast %cst_11 : f32 to vector<2x64xf32>
    %18 = arith.mulf %17, %16 : vector<2x64xf32>
    %cst_12 = arith.constant 5.000000e-01 : f32
    %19 = vector.broadcast %cst_12 : f32 to vector<2x64xf32>
    %20 = arith.addf %18, %19 : vector<2x64xf32>
    %21 = vector.extract_strided_slice %15 {offsets = [0, 64], sizes = [2, 32], strides = [1, 1]} : vector<2x128xf32> to vector<2x32xf32>
    %22 = vector.extract_strided_slice %15 {offsets = [0, 96], sizes = [2, 32], strides = [1, 1]} : vector<2x128xf32> to vector<2x32xf32>
    %cst_13 = arith.constant 5.000000e-01 : f32
    %23 = vector.broadcast %cst_13 : f32 to vector<2x32xf32>
    %24 = arith.mulf %23, %22 : vector<2x32xf32>
    %cst_14 = arith.constant 5.000000e-01 : f32
    %25 = vector.broadcast %cst_14 : f32 to vector<2x32xf32>
    %26 = arith.addf %24, %25 : vector<2x32xf32>
    %27 = vector.extract_strided_slice %20 {offsets = [0, 32], sizes = [2, 32], strides = [1, 1]} : vector<2x64xf32> to vector<2x32xf32>
    %28 = arith.mulf %27, %10 : vector<2x32xf32>
    %29 = vector.extract_strided_slice %20 {offsets = [0, 0], sizes = [2, 32], strides = [1, 1]} : vector<2x64xf32> to vector<2x32xf32>
    %30 = arith.mulf %29, %21 : vector<2x32xf32>
    %31 = arith.addf %28, %30 : vector<2x32xf32>
    %32 = math.tanh %31 : vector<2x32xf32>
    %33 = arith.mulf %26, %32 : vector<2x32xf32>
    %34 = vector.extract_strided_slice %7 {offsets = [1, 0, 0], sizes = [1, 2, 128], strides = [1, 1, 1]} : vector<8x2x128xf32> to vector<1x2x128xf32>
    %35 = vector.shape_cast %34 : vector<1x2x128xf32> to vector<2x128xf32>
    %cst_15 = arith.constant dense<0.000000e+00> : vector<2x128xf32>
    %36 = tpu.matmul %33, %8, %cst_15 {dimension_numbers = #tpu.dot_dimension_numbers<[1], [0], [0], [1], [0, 0, 1, 1], [], []>} : vector<2x32xf32>, vector<32x128xf32>, vector<2x128xf32> -> vector<2x128xf32>
    %37 = arith.addf %35, %36 : vector<2x128xf32>
    %38 = math.tanh %37 : vector<2x128xf32>
    %39 = vector.extract_strided_slice %38 {offsets = [0, 0], sizes = [2, 64], strides = [1, 1]} : vector<2x128xf32> to vector<2x64xf32>
    %cst_16 = arith.constant 5.000000e-01 : f32
    %40 = vector.broadcast %cst_16 : f32 to vector<2x64xf32>
    %41 = arith.mulf %40, %39 : vector<2x64xf32>
    %cst_17 = arith.constant 5.000000e-01 : f32
    %42 = vector.broadcast %cst_17 : f32 to vector<2x64xf32>
    %43 = arith.addf %41, %42 : vector<2x64xf32>
    %44 = vector.extract_strided_slice %38 {offsets = [0, 64], sizes = [2, 32], strides = [1, 1]} : vector<2x128xf32> to vector<2x32xf32>
    %45 = vector.extract_strided_slice %38 {offsets = [0, 96], sizes = [2, 32], strides = [1, 1]} : vector<2x128xf32> to vector<2x32xf32>
    %cst_18 = arith.constant 5.000000e-01 : f32
    %46 = vector.broadcast %cst_18 : f32 to vector<2x32xf32>
    %47 = arith.mulf %46, %45 : vector<2x32xf32>
    %cst_19 = arith.constant 5.000000e-01 : f32
    %48 = vector.broadcast %cst_19 : f32 to vector<2x32xf32>
    %49 = arith.addf %47, %48 : vector<2x32xf32>
    %50 = vector.extract_strided_slice %43 {offsets = [0, 32], sizes = [2, 32], strides = [1, 1]} : vector<2x64xf32> to vector<2x32xf32>
    %51 = arith.mulf %50, %31 : vector<2x32xf32>
    %52 = vector.extract_strided_slice %43 {offsets = [0, 0], sizes = [2, 32], strides = [1, 1]} : vector<2x64xf32> to vector<2x32xf32>
    %53 = arith.mulf %52, %44 : vector<2x32xf32>
    %54 = arith.addf %51, %53 : vector<2x32xf32>
    %55 = math.tanh %54 : vector<2x32xf32>
    %56 = arith.mulf %49, %55 : vector<2x32xf32>
    %57 = vector.extract_strided_slice %7 {offsets = [2, 0, 0], sizes = [1, 2, 128], strides = [1, 1, 1]} : vector<8x2x128xf32> to vector<1x2x128xf32>
    %58 = vector.shape_cast %57 : vector<1x2x128xf32> to vector<2x128xf32>
    %cst_20 = arith.constant dense<0.000000e+00> : vector<2x128xf32>
    %59 = tpu.matmul %56, %8, %cst_20 {dimension_numbers = #tpu.dot_dimension_numbers<[1], [0], [0], [1], [0, 0, 1, 1], [], []>} : vector<2x32xf32>, vector<32x128xf32>, vector<2x128xf32> -> vector<2x128xf32>
    %60 = arith.addf %58, %59 : vector<2x128xf32>
    %61 = math.tanh %60 : vector<2x128xf32>
    %62 = vector.extract_strided_slice %61 {offsets = [0, 0], sizes = [2, 64], strides = [1, 1]} : vector<2x128xf32> to vector<2x64xf32>
    %cst_21 = arith.constant 5.000000e-01 : f32
    %63 = vector.broadcast %cst_21 : f32 to vector<2x64xf32>
    %64 = arith.mulf %63, %62 : vector<2x64xf32>
    %cst_22 = arith.constant 5.000000e-01 : f32
    %65 = vector.broadcast %cst_22 : f32 to vector<2x64xf32>
    %66 = arith.addf %64, %65 : vector<2x64xf32>
    %67 = vector.extract_strided_slice %61 {offsets = [0, 64], sizes = [2, 32], strides = [1, 1]} : vector<2x128xf32> to vector<2x32xf32>
    %68 = vector.extract_strided_slice %61 {offsets = [0, 96], sizes = [2, 32], strides = [1, 1]} : vector<2x128xf32> to vector<2x32xf32>
    %cst_23 = arith.constant 5.000000e-01 : f32
    %69 = vector.broadcast %cst_23 : f32 to vector<2x32xf32>
    %70 = arith.mulf %69, %68 : vector<2x32xf32>
    %cst_24 = arith.constant 5.000000e-01 : f32
    %71 = vector.broadcast %cst_24 : f32 to vector<2x32xf32>
    %72 = arith.addf %70, %71 : vector<2x32xf32>
    %73 = vector.extract_strided_slice %66 {offsets = [0, 32], sizes = [2, 32], strides = [1, 1]} : vector<2x64xf32> to vector<2x32xf32>
    %74 = arith.mulf %73, %54 : vector<2x32xf32>
    %75 = vector.extract_strided_slice %66 {offsets = [0, 0], sizes = [2, 32], strides = [1, 1]} : vector<2x64xf32> to vector<2x32xf32>
    %76 = arith.mulf %75, %67 : vector<2x32xf32>
    %77 = arith.addf %74, %76 : vector<2x32xf32>
    %78 = math.tanh %77 : vector<2x32xf32>
    %79 = arith.mulf %72, %78 : vector<2x32xf32>
    %80 = vector.extract_strided_slice %7 {offsets = [3, 0, 0], sizes = [1, 2, 128], strides = [1, 1, 1]} : vector<8x2x128xf32> to vector<1x2x128xf32>
    %81 = vector.shape_cast %80 : vector<1x2x128xf32> to vector<2x128xf32>
    %cst_25 = arith.constant dense<0.000000e+00> : vector<2x128xf32>
    %82 = tpu.matmul %79, %8, %cst_25 {dimension_numbers = #tpu.dot_dimension_numbers<[1], [0], [0], [1], [0, 0, 1, 1], [], []>} : vector<2x32xf32>, vector<32x128xf32>, vector<2x128xf32> -> vector<2x128xf32>
    %83 = arith.addf %81, %82 : vector<2x128xf32>
    %84 = math.tanh %83 : vector<2x128xf32>
    %85 = vector.extract_strided_slice %84 {offsets = [0, 0], sizes = [2, 64], strides = [1, 1]} : vector<2x128xf32> to vector<2x64xf32>
    %cst_26 = arith.constant 5.000000e-01 : f32
    %86 = vector.broadcast %cst_26 : f32 to vector<2x64xf32>
    %87 = arith.mulf %86, %85 : vector<2x64xf32>
    %cst_27 = arith.constant 5.000000e-01 : f32
    %88 = vector.broadcast %cst_27 : f32 to vector<2x64xf32>
    %89 = arith.addf %87, %88 : vector<2x64xf32>
    %90 = vector.extract_strided_slice %84 {offsets = [0, 64], sizes = [2, 32], strides = [1, 1]} : vector<2x128xf32> to vector<2x32xf32>
    %91 = vector.extract_strided_slice %84 {offsets = [0, 96], sizes = [2, 32], strides = [1, 1]} : vector<2x128xf32> to vector<2x32xf32>
    %cst_28 = arith.constant 5.000000e-01 : f32
    %92 = vector.broadcast %cst_28 : f32 to vector<2x32xf32>
    %93 = arith.mulf %92, %91 : vector<2x32xf32>
    %cst_29 = arith.constant 5.000000e-01 : f32
    %94 = vector.broadcast %cst_29 : f32 to vector<2x32xf32>
    %95 = arith.addf %93, %94 : vector<2x32xf32>
    %96 = vector.extract_strided_slice %89 {offsets = [0, 32], sizes = [2, 32], strides = [1, 1]} : vector<2x64xf32> to vector<2x32xf32>
    %97 = arith.mulf %96, %77 : vector<2x32xf32>
    %98 = vector.extract_strided_slice %89 {offsets = [0, 0], sizes = [2, 32], strides = [1, 1]} : vector<2x64xf32> to vector<2x32xf32>
    %99 = arith.mulf %98, %90 : vector<2x32xf32>
    %100 = arith.addf %97, %99 : vector<2x32xf32>
    %101 = math.tanh %100 : vector<2x32xf32>
    %102 = arith.mulf %95, %101 : vector<2x32xf32>
    %103 = vector.extract_strided_slice %7 {offsets = [4, 0, 0], sizes = [1, 2, 128], strides = [1, 1, 1]} : vector<8x2x128xf32> to vector<1x2x128xf32>
    %104 = vector.shape_cast %103 : vector<1x2x128xf32> to vector<2x128xf32>
    %cst_30 = arith.constant dense<0.000000e+00> : vector<2x128xf32>
    %105 = tpu.matmul %102, %8, %cst_30 {dimension_numbers = #tpu.dot_dimension_numbers<[1], [0], [0], [1], [0, 0, 1, 1], [], []>} : vector<2x32xf32>, vector<32x128xf32>, vector<2x128xf32> -> vector<2x128xf32>
    %106 = arith.addf %104, %105 : vector<2x128xf32>
    %107 = math.tanh %106 : vector<2x128xf32>
    %108 = vector.extract_strided_slice %107 {offsets = [0, 0], sizes = [2, 64], strides = [1, 1]} : vector<2x128xf32> to vector<2x64xf32>
    %cst_31 = arith.constant 5.000000e-01 : f32
    %109 = vector.broadcast %cst_31 : f32 to vector<2x64xf32>
    %110 = arith.mulf %109, %108 : vector<2x64xf32>
    %cst_32 = arith.constant 5.000000e-01 : f32
    %111 = vector.broadcast %cst_32 : f32 to vector<2x64xf32>
    %112 = arith.addf %110, %111 : vector<2x64xf32>
    %113 = vector.extract_strided_slice %107 {offsets = [0, 64], sizes = [2, 32], strides = [1, 1]} : vector<2x128xf32> to vector<2x32xf32>
    %114 = vector.extract_strided_slice %107 {offsets = [0, 96], sizes = [2, 32], strides = [1, 1]} : vector<2x128xf32> to vector<2x32xf32>
    %cst_33 = arith.constant 5.000000e-01 : f32
    %115 = vector.broadcast %cst_33 : f32 to vector<2x32xf32>
    %116 = arith.mulf %115, %114 : vector<2x32xf32>
    %cst_34 = arith.constant 5.000000e-01 : f32
    %117 = vector.broadcast %cst_34 : f32 to vector<2x32xf32>
    %118 = arith.addf %116, %117 : vector<2x32xf32>
    %119 = vector.extract_strided_slice %112 {offsets = [0, 32], sizes = [2, 32], strides = [1, 1]} : vector<2x64xf32> to vector<2x32xf32>
    %120 = arith.mulf %119, %100 : vector<2x32xf32>
    %121 = vector.extract_strided_slice %112 {offsets = [0, 0], sizes = [2, 32], strides = [1, 1]} : vector<2x64xf32> to vector<2x32xf32>
    %122 = arith.mulf %121, %113 : vector<2x32xf32>
    %123 = arith.addf %120, %122 : vector<2x32xf32>
    %124 = math.tanh %123 : vector<2x32xf32>
    %125 = arith.mulf %118, %124 : vector<2x32xf32>
    %126 = vector.extract_strided_slice %7 {offsets = [5, 0, 0], sizes = [1, 2, 128], strides = [1, 1, 1]} : vector<8x2x128xf32> to vector<1x2x128xf32>
    %127 = vector.shape_cast %126 : vector<1x2x128xf32> to vector<2x128xf32>
    %cst_35 = arith.constant dense<0.000000e+00> : vector<2x128xf32>
    %128 = tpu.matmul %125, %8, %cst_35 {dimension_numbers = #tpu.dot_dimension_numbers<[1], [0], [0], [1], [0, 0, 1, 1], [], []>} : vector<2x32xf32>, vector<32x128xf32>, vector<2x128xf32> -> vector<2x128xf32>
    %129 = arith.addf %127, %128 : vector<2x128xf32>
    %130 = math.tanh %129 : vector<2x128xf32>
    %131 = vector.extract_strided_slice %130 {offsets = [0, 0], sizes = [2, 64], strides = [1, 1]} : vector<2x128xf32> to vector<2x64xf32>
    %cst_36 = arith.constant 5.000000e-01 : f32
    %132 = vector.broadcast %cst_36 : f32 to vector<2x64xf32>
    %133 = arith.mulf %132, %131 : vector<2x64xf32>
    %cst_37 = arith.constant 5.000000e-01 : f32
    %134 = vector.broadcast %cst_37 : f32 to vector<2x64xf32>
    %135 = arith.addf %133, %134 : vector<2x64xf32>
    %136 = vector.extract_strided_slice %130 {offsets = [0, 64], sizes = [2, 32], strides = [1, 1]} : vector<2x128xf32> to vector<2x32xf32>
    %137 = vector.extract_strided_slice %130 {offsets = [0, 96], sizes = [2, 32], strides = [1, 1]} : vector<2x128xf32> to vector<2x32xf32>
    %cst_38 = arith.constant 5.000000e-01 : f32
    %138 = vector.broadcast %cst_38 : f32 to vector<2x32xf32>
    %139 = arith.mulf %138, %137 : vector<2x32xf32>
    %cst_39 = arith.constant 5.000000e-01 : f32
    %140 = vector.broadcast %cst_39 : f32 to vector<2x32xf32>
    %141 = arith.addf %139, %140 : vector<2x32xf32>
    %142 = vector.extract_strided_slice %135 {offsets = [0, 32], sizes = [2, 32], strides = [1, 1]} : vector<2x64xf32> to vector<2x32xf32>
    %143 = arith.mulf %142, %123 : vector<2x32xf32>
    %144 = vector.extract_strided_slice %135 {offsets = [0, 0], sizes = [2, 32], strides = [1, 1]} : vector<2x64xf32> to vector<2x32xf32>
    %145 = arith.mulf %144, %136 : vector<2x32xf32>
    %146 = arith.addf %143, %145 : vector<2x32xf32>
    %147 = math.tanh %146 : vector<2x32xf32>
    %148 = arith.mulf %141, %147 : vector<2x32xf32>
    %149 = vector.extract_strided_slice %7 {offsets = [6, 0, 0], sizes = [1, 2, 128], strides = [1, 1, 1]} : vector<8x2x128xf32> to vector<1x2x128xf32>
    %150 = vector.shape_cast %149 : vector<1x2x128xf32> to vector<2x128xf32>
    %cst_40 = arith.constant dense<0.000000e+00> : vector<2x128xf32>
    %151 = tpu.matmul %148, %8, %cst_40 {dimension_numbers = #tpu.dot_dimension_numbers<[1], [0], [0], [1], [0, 0, 1, 1], [], []>} : vector<2x32xf32>, vector<32x128xf32>, vector<2x128xf32> -> vector<2x128xf32>
    %152 = arith.addf %150, %151 : vector<2x128xf32>
    %153 = math.tanh %152 : vector<2x128xf32>
    %154 = vector.extract_strided_slice %153 {offsets = [0, 0], sizes = [2, 64], strides = [1, 1]} : vector<2x128xf32> to vector<2x64xf32>
    %cst_41 = arith.constant 5.000000e-01 : f32
    %155 = vector.broadcast %cst_41 : f32 to vector<2x64xf32>
    %156 = arith.mulf %155, %154 : vector<2x64xf32>
    %cst_42 = arith.constant 5.000000e-01 : f32
    %157 = vector.broadcast %cst_42 : f32 to vector<2x64xf32>
    %158 = arith.addf %156, %157 : vector<2x64xf32>
    %159 = vector.extract_strided_slice %153 {offsets = [0, 64], sizes = [2, 32], strides = [1, 1]} : vector<2x128xf32> to vector<2x32xf32>
    %160 = vector.extract_strided_slice %153 {offsets = [0, 96], sizes = [2, 32], strides = [1, 1]} : vector<2x128xf32> to vector<2x32xf32>
    %cst_43 = arith.constant 5.000000e-01 : f32
    %161 = vector.broadcast %cst_43 : f32 to vector<2x32xf32>
    %162 = arith.mulf %161, %160 : vector<2x32xf32>
    %cst_44 = arith.constant 5.000000e-01 : f32
    %163 = vector.broadcast %cst_44 : f32 to vector<2x32xf32>
    %164 = arith.addf %162, %163 : vector<2x32xf32>
    %165 = vector.extract_strided_slice %158 {offsets = [0, 32], sizes = [2, 32], strides = [1, 1]} : vector<2x64xf32> to vector<2x32xf32>
    %166 = arith.mulf %165, %146 : vector<2x32xf32>
    %167 = vector.extract_strided_slice %158 {offsets = [0, 0], sizes = [2, 32], strides = [1, 1]} : vector<2x64xf32> to vector<2x32xf32>
    %168 = arith.mulf %167, %159 : vector<2x32xf32>
    %169 = arith.addf %166, %168 : vector<2x32xf32>
    %170 = math.tanh %169 : vector<2x32xf32>
    %171 = arith.mulf %164, %170 : vector<2x32xf32>
    %172 = vector.extract_strided_slice %7 {offsets = [7, 0, 0], sizes = [1, 2, 128], strides = [1, 1, 1]} : vector<8x2x128xf32> to vector<1x2x128xf32>
    %173 = vector.shape_cast %172 : vector<1x2x128xf32> to vector<2x128xf32>
    %cst_45 = arith.constant dense<0.000000e+00> : vector<2x128xf32>
    %174 = tpu.matmul %171, %8, %cst_45 {dimension_numbers = #tpu.dot_dimension_numbers<[1], [0], [0], [1], [0, 0, 1, 1], [], []>} : vector<2x32xf32>, vector<32x128xf32>, vector<2x128xf32> -> vector<2x128xf32>
    %175 = arith.addf %173, %174 : vector<2x128xf32>
    %176 = math.tanh %175 : vector<2x128xf32>
    %177 = vector.extract_strided_slice %176 {offsets = [0, 0], sizes = [2, 64], strides = [1, 1]} : vector<2x128xf32> to vector<2x64xf32>
    %cst_46 = arith.constant 5.000000e-01 : f32
    %178 = vector.broadcast %cst_46 : f32 to vector<2x64xf32>
    %179 = arith.mulf %178, %177 : vector<2x64xf32>
    %cst_47 = arith.constant 5.000000e-01 : f32
    %180 = vector.broadcast %cst_47 : f32 to vector<2x64xf32>
    %181 = arith.addf %179, %180 : vector<2x64xf32>
    %182 = vector.extract_strided_slice %176 {offsets = [0, 64], sizes = [2, 32], strides = [1, 1]} : vector<2x128xf32> to vector<2x32xf32>
    %183 = vector.extract_strided_slice %176 {offsets = [0, 96], sizes = [2, 32], strides = [1, 1]} : vector<2x128xf32> to vector<2x32xf32>
    %cst_48 = arith.constant 5.000000e-01 : f32
    %184 = vector.broadcast %cst_48 : f32 to vector<2x32xf32>
    %185 = arith.mulf %184, %183 : vector<2x32xf32>
    %cst_49 = arith.constant 5.000000e-01 : f32
    %186 = vector.broadcast %cst_49 : f32 to vector<2x32xf32>
    %187 = arith.addf %185, %186 : vector<2x32xf32>
    %188 = vector.extract_strided_slice %181 {offsets = [0, 32], sizes = [2, 32], strides = [1, 1]} : vector<2x64xf32> to vector<2x32xf32>
    %189 = arith.mulf %188, %169 : vector<2x32xf32>
    %190 = vector.extract_strided_slice %181 {offsets = [0, 0], sizes = [2, 32], strides = [1, 1]} : vector<2x64xf32> to vector<2x32xf32>
    %191 = arith.mulf %190, %182 : vector<2x32xf32>
    %192 = arith.addf %189, %191 : vector<2x32xf32>
    %193 = math.tanh %192 : vector<2x32xf32>
    %194 = arith.mulf %187, %193 : vector<2x32xf32>
    %c0_50 = arith.constant 0 : index
    %c0_51 = arith.constant 0 : index
    %195 = vector.load %arg4[%c0_50, %c0_51] : memref<32x32xf32, #tpu.memory_space<vmem>>, vector<32x32xf32>
    %cst_52 = arith.constant dense<0.000000e+00> : vector<2x32xf32>
    %196 = tpu.matmul %194, %195, %cst_52 {dimension_numbers = #tpu.dot_dimension_numbers<[1], [0], [0], [1], [0, 0, 1, 1], [], []>} : vector<2x32xf32>, vector<32x32xf32>, vector<2x32xf32> -> vector<2x32xf32>
    %c0_53 = arith.constant 0 : index
    %c0_54 = arith.constant 0 : index
    %197 = vector.load %arg5[%c0_53, %c0_54] : memref<1x32xf32, #tpu.memory_space<vmem>>, vector<1x32xf32>
    %198 = vector.broadcast %197 : vector<1x32xf32> to vector<2x32xf32>
    %199 = arith.addf %196, %198 : vector<2x32xf32>
    %cst_55 = arith.constant 0.000000e+00 : f32
    %200 = vector.broadcast %cst_55 : f32 to vector<2x32xf32>
    %201 = arith.maximumf %199, %200 : vector<2x32xf32>
    %c0_56 = arith.constant 0 : index
    %c0_57 = arith.constant 0 : index
    %202 = vector.load %arg6[%c0_56, %c0_57] : memref<1x32xf32, #tpu.memory_space<vmem>>, vector<1x32xf32>
    %203 = vector.broadcast %202 : vector<1x32xf32> to vector<2x32xf32>
    %204 = arith.mulf %201, %203 : vector<2x32xf32>
    %cst_58 = arith.constant dense<0.000000e+00> : vector<2xf32>
    %205 = vector.multi_reduction <add>, %204, %cst_58 [1] : vector<2x32xf32> to vector<2xf32>
    %206 = vector.shape_cast %205 : vector<2xf32> to vector<2x1xf32>
    %c0_59 = arith.constant 0 : index
    %c0_60 = arith.constant 0 : index
    %207 = vector.load %arg7[%c0_59, %c0_60] : memref<1x1xf32, #tpu.memory_space<vmem>>, vector<1x1xf32>
    %208 = vector.broadcast %207 : vector<1x1xf32> to vector<2x1xf32>
    %209 = arith.addf %206, %208 : vector<2x1xf32>
    %c0_61 = arith.constant 0 : index
    %c0_62 = arith.constant 0 : index
    %210 = vector.load %arg8[%c0_61, %c0_62] : memref<2x1xf32, #tpu.memory_space<vmem>>, vector<2x1xf32>
    tpu.vector_store %arg8[%c0_61, %c0_62], %209 {strides = array<i32>} : memref<2x1xf32, #tpu.memory_space<vmem>>, vector<2x1xf32>,
    return
  }
}

</mosaic_0001>

<bundles_post_ra>
// kernel: tpu_custom_call.1
= control target key start
LH: loop header
LB: loop body
LE: loop exit
PB: predicated region body
PF: predicated region fallthrough
CT: control target
= control target key end

     0   :  { %s1754_s0 = inlined_call_operand.hbm [shape: f32[8,2,8], index: 0, kind: input, shape index: {}]   ;;  %s1755_s1 = inlined_call_operand.hbm [shape: f32[8,128], index: 1, kind: input, shape index: {}]   ;;  %s1756_s2 = inlined_call_operand.hbm [shape: f32[32,128], index: 2, kind: input, shape index: {}]   ;;  %s1757_s3 = inlined_call_operand.vmem [shape: f32[1,128], index: 3, kind: input, shape index: {}]   ;;  %s1758_s4 = inlined_call_operand.hbm [shape: f32[32,32], index: 4, kind: input, shape index: {}]   ;;  %s1759_s5 = inlined_call_operand.vmem [shape: f32[1,32], index: 5, kind: input, shape index: {}]   ;;  %s1760_s6 = inlined_call_operand.vmem [shape: f32[1,32], index: 6, kind: input, shape index: {}]   ;;  %s1761_s7 = inlined_call_operand.<no memory space> [shape: f32[1,1], index: 7, kind: input, shape index: {}]   ;;  %s1762_s8 = inlined_call_operand.vmem [shape: f32[2,1], index: 8, kind: output, shape index: {}]  }
   0x1   :  { %v13_v0 = vstv %s1761_s7 }
   0x2   :  { %14 = vst [vmem:[#allocation2] sm:$0x1] %v13_v0 }
   0x3   :  { %15 = vsyncpa [#allocation4], 0 }
   0x4   :  { %16 = vsyncpa [#allocation6], 0 }
   0x5   :  { %17 = vsyncpa [#allocation9], 0  ;;  %s1505_s29 = smov [#allocation5]   ;;  %s1506_s9 = smov [#allocation3]  }
   0x6   :  { %s36_s30 = sshll.u32 %s1505_s29, 4  ;;  %s23_s10 = sshll.u32 %s1506_s9, 4  ;;  %s37_s30 = int_to_ptr.vmem [resolvable:$true] %s36_s30  ;;  %s24_s10 = int_to_ptr.vmem [resolvable:$true] %s23_s10 }
   0x7   :  { %s1427_s11 = scalar_lea.vmem %s37_s30, 128  ;;  %p1432_p1 = scmp.lt.s32.totalorder %s37_s30, %s37_s30 }
   0x8   :  { %p1428_p0 = scmp.ne.s32.totalorder %s37_s30, %s1427_s11  ;;  %p1433_p2 = scmp.lt.s32.totalorder %s1427_s11, %s1427_s11 }
   0xa   :  { %p1434_p3 = por %p1433_p2, %p1432_p1 }
   0xc   :  { %p1435_p4 = pnand %p1434_p3, %p1428_p0 }
   0xe   :  { %1438 = shalt.err (!%p1435_p4)
}
   0xf   :  { %39 = dma.hbm_to_vmem [thread:$0]  %s1755_s1, 128, %s37_s30, [#allocation6]  }
  0x10   :  { %s1447_s7 = scalar_lea.vmem %s24_s10, 256  ;;  %p1452_p6 = scmp.lt.s32.totalorder %s24_s10, %s24_s10 }
  0x11   :  { %p1448_p5 = scmp.ne.s32.totalorder %s24_s10, %s1447_s7  ;;  %p1453_p7 = scmp.lt.s32.totalorder %s1447_s7, %s1447_s7 }
  0x13   :  { %p1454_p8 = por %p1453_p7, %p1452_p6 }
  0x15   :  { %p1455_p9 = pnand %p1454_p8, %p1448_p5 }
  0x17   :  { %1458 = shalt.err (!%p1455_p9)
}
  0x18   :  { %s1507_s14 = smov 32   ;;  %s1508_s15 = smov 2  }
  0x19   :  { %29 = dma.hbm_to_vmem [thread:$0]  %s1754_s0, 256, %s24_s10, [#allocation4], %s1507_s14, %s1507_s14, %s1508_s15  }
  0x1a   :  { %s1509_s18 = smov [#allocation7]  }
  0x1b   :  { %s45_s19 = sshll.u32 %s1509_s18, 4  ;;  %s46_s19 = int_to_ptr.vmem [resolvable:$true] %s45_s19 }
  0x1c   :  { %s1467_s20 = scalar_lea.vmem %s46_s19, 512  ;;  %p1472_p11 = scmp.lt.s32.totalorder %s46_s19, %s46_s19 }
  0x1d   :  { %p1468_p10 = scmp.ne.s32.totalorder %s46_s19, %s1467_s20  ;;  %p1473_p12 = scmp.lt.s32.totalorder %s1467_s20, %s1467_s20 }
  0x1f   :  { %p1474_p13 = por %p1473_p12, %p1472_p11 }
  0x21   :  { %p1475_p0 = pnand %p1474_p13, %p1468_p10 }
  0x23   :  { %1478 = shalt.err (!%p1475_p0)
}
  0x24   :  { %s1510_s1 = smov 128   ;;  %s1511_s21 = smov 8  }
  0x25   :  { %51 = dma.hbm_to_vmem [thread:$0]  %s1756_s2, 512, %s46_s19, [#allocation6], %s1510_s1, %s1510_s1, %s1511_s21  }
  0x26   :  { %s1512_s24 = smov [#allocation8]  }
  0x27   :  { %s59_s25 = sshll.u32 %s1512_s24, 4  ;;  %s60_s25 = int_to_ptr.vmem [resolvable:$true] %s59_s25 }
  0x28   :  { %s1487_s0 = scalar_lea.vmem %s60_s25, 512  ;;  %p1492_p2 = scmp.lt.s32.totalorder %s60_s25, %s60_s25 }
  0x29   :  { %p1488_p1 = scmp.ne.s32.totalorder %s60_s25, %s1487_s0  ;;  %p1493_p3 = scmp.lt.s32.totalorder %s1487_s0, %s1487_s0 }
  0x2b   :  { %p1494_p4 = por %p1493_p3, %p1492_p2 }
  0x2d   :  { %p1495_p5 = pnand %p1494_p4, %p1488_p1 }
  0x2f   :  { %1498 = shalt.err (!%p1495_p5)
}
  0x30   :  { %65 = dma.hbm_to_vmem [thread:$0]  %s1758_s4, 512, %s60_s25, [#allocation9], %s1510_s1, %s1510_s1, %s1511_s21  }
  0x31   :  { %1499 = dma.done.wait [#allocation4], 256  }
  0x32   :  { %1500 = vsyncadd [#allocation4], 4294967040 }
  0x33   :  { %1501 = dma.done.wait [#allocation6], 640  }
  0x34   :  { %1502 = vsyncadd [#allocation6], 4294966656 }
  0x35   :  { %1503 = dma.done.wait [#allocation9], 512  }
  0x36   :  { %1504 = vsyncadd [#allocation9], 4294966784  ;;  %v113_v1 = vlaneseq  ;;  %v1513_v2 = vmov 0.0   ;;  %v1514_v3 = vmov 1983009808   ;;  %vm1515_vm0 = vmmov 0  }
  0x37   :  { %1276 = vmatprep.subr.mxu1 %v1513_v2  ;;  %v111_v4 = vunpack.c.l.s4 %v1514_v3  ;;  %1284 = vmatprep.mubr.msk.f32.mxu1 %vm1515_vm0, %v1513_v2  ;;  %v1582_v7 = vld [vmem:[#allocation7 + $0x18] sm:$0xff]  ;;  %v84_v9 = vld [vmem:[#allocation3] sm:$0x3]  ;;  %v85_v11 = vld [vmem:[#allocation3 + $0x2] sm:$0x3]  ;;  %vm142_vm1 = vcmask 64512  }
  0x38   :  { %v114_v6 = vshrl.u32 %v113_v1, 7  ;;  %v92_v8 = vld [vmem:[#allocation5] sm:$0xff]  ;;  %1277 = vmatpush3.msra.mxu1 %v1582_v7  ;;  %v86_v12 = vld [vmem:[#allocation3 + $0x4] sm:$0x3]  ;;  %v87_v13 = vld [vmem:[#allocation3 + $0x6] sm:$0x3]  ;;  %v108_v14 = vcombine.low %v84_v9, %v85_v11 }
  0x39   :  { %v112_v5 = vunpack.c.0.s8 %v111_v4  ;;  %1271 = vmatprep.subr.mxu0 %v92_v8  ;;  %1278 = vmatprep.subr.mxu1 %v1513_v2  ;;  %v109_v15 = vcombine.low %v86_v12, %v87_v13  ;;  %v1588_v16 = vld [vmem:[#allocation7 + $0x10] sm:$0xff]  ;;  %v1591_v22 = vld [vmem:[#allocation7 + $0x8] sm:$0xff]  ;;  %v1597_v26 = vld [vmem:[#allocation7] sm:$0xff]  ;;  %s1516_s28 = smov 64   ;;  %vm270_vm2 = vcmask 261120   ;;  %vm1188_vm3 = vcmask 254976  }
  0x3a   :  { %1272 = vmatpush3.msra.mxu0 %v92_v8  ;;  %v88_v17 = vld [vmem:[#allocation3 + $0x8] sm:$0x3]  ;;  %v89_v18 = vld [vmem:[#allocation3 + $0xa] sm:$0x3]  ;;  %1279 = vmatpush3.msra.mxu1 %v1588_v16  ;;  %v90_v19 = vld [vmem:[#allocation3 + $0xc] sm:$0x3] }
  0x3b   :  { %v1584_v10 = vsub.s32 %v112_v5, %v114_v6  ;;  %v91_v20 = vld [vmem:[#allocation3 + $0xe] sm:$0x3]  ;;  %v125_v21 = vcombine.low %v88_v17, %v89_v18  ;;  %1287 = vmatprep.subr.mxu0 %v1513_v2  ;;  %1280 = vmatprep.subr.mxu1 %v1513_v2  ;;  %v1209_v31 = vld [vmem:[%s1757_s3] ss:$0 sm:$0xff]  ;;  %vm1200_vm4 = vcmask 1024  }
  0x3c   :  { %v126_v25 = vcombine.low %v90_v19, %v91_v20  ;;  %1281 = vmatpush3.msra.mxu1 %v1591_v22 }
  0x3d   :  { %v116_v23 = vrot.slane %v108_v14, %v1584_v10  ;;  %v123_v24 = vrot.slane %v109_v15, %v1584_v10  ;;  %v133_v27 = vrot.slane %v125_v21, %v1584_v10  ;;  %1282 = vmatprep.subr.mxu1 %v1513_v2 }
  0x3e   :  { %v140_v29 = vrot.slane %v126_v25, %v1584_v10  ;;  %1283 = vmatpush3.msra.mxu1 %v1597_v26 }
  0x3f   :  { %v124_v28 = vcombine.low %v116_v23, %v123_v24  ;;  %1285 = vmatmul.mubr.f32.vlgmr.msra.gmra.mxu1 %v1513_v2  ;;  %1298 = vmatprep.subr.mxu1 %v1513_v2 }
  0x40   :  { %v141_v30 = vcombine.low %v133_v27, %v140_v29  ;;  %1306 = vmatprep.mubr.msk.f32.mxu1 %vm1515_vm0, %v1513_v2  ;;  %1299 = vmatpush3.msra.mxu1 %v1582_v7 }
  0x41   :  { %1273 = vmatprep.mubr.msk.f32.mxu0 %vm142_vm1, %v124_v28  ;;  %1300 = vmatprep.subr.mxu1 %v1513_v2 }
  0x42   :  { %1274 = vmatmul.mubr.msk.f32.vlgmr.msra.gmra.mxu0 %vm142_vm1, %v141_v30  ;;  %1301 = vmatpush3.msra.mxu1 %v1588_v16 }
  0x43   :  { %1288 = vmatpush3.msra.mxu0 %v1582_v7  ;;  %1295 = vmatprep.mubr.msk.f32.mxu0 %vm1515_vm0, %v1513_v2 }
  0x44   :  { %1289 = vmatprep.subr.mxu0 %v1513_v2  ;;  %1302 = vmatprep.subr.mxu1 %v1513_v2 }
  0x45   :  { %1290 = vmatpush3.msra.mxu0 %v1588_v16  ;;  %1303 = vmatpush3.msra.mxu1 %v1591_v22 }
  0x46   :  { %1291 = vmatprep.subr.mxu0 %v1513_v2  ;;  %1304 = vmatprep.subr.mxu1 %v1513_v2 }
  0x47   :  { %1292 = vmatpush3.msra.mxu0 %v1591_v22  ;;  %1305 = vmatpush3.msra.mxu1 %v1597_v26 }
  0x48   :  { %1293 = vmatprep.subr.mxu0 %v1513_v2  ;;  %1320 = vmatprep.subr.mxu1 %v1513_v2 }
  0x49   :  { %1294 = vmatpush3.msra.mxu0 %v1597_v26 }
  0x4a   :  { %1309 = vmatprep.subr.mxu0 %v1513_v2 }
  0xff   :  { %v340_v32 = vpop.f32.mrf.mxu1 }
 0x101   :  { %v1286_v34 = vpop.f32.mrf.mxu1 }
 0x102   :  { %v1275_v33 = vpop.f32.mrf.mxu0 }
 0x103   :  { %v1629_v35 = vadd.f32 %v1275_v33, %v1209_v31 }
 0x104   :  { %v213_v36 = vpop.f32.mrf.mxu0 }
 0x105   :  { %v1631_v37 = vadd.f32 %v1209_v31, %v213_v36 }
 0x107   :  { %v231_v38 = vrot.slane %v1631_v37, %v1584_v10  ;;  %v224_v8 = vcombine.high %v1631_v37, %v1631_v37 }
 0x109   :  { %v344_v39 = vadd.f32 %v340_v32, %v231_v38  ;;  %v239_v53 = vcombine.high %v231_v38, %v231_v38  ;;  %v238_v9 = vrot.slane %v224_v8, %v1584_v10 }
 0x10b   :  { %1387 = vtanh.f32 %v344_v39  ;;  %v240_v30 = vcombine.high %v238_v9, %v238_v9 }
 0x118   :  { %v1388_v40 = vpop.eup %1387 }
 0x119   :  { %350 = vrot.lane.b32.xlu0 %v1388_v40, %s1516_s28  ;;  %v346_v41 = vmul.f32 0.5, %v1388_v40 }
 0x11b   :  { %v347_v42 = vadd.f32 0.5, %v346_v41 }
 0x11d   :  { %v348_v45 = vmul.f32 0.0, %v347_v42 }
 0x18b   :  { %v351_v43 = vpop.permute.xlu0 %350 }
 0x18c   :  { %v353_v44 = vmul.f32 %v351_v43, %v347_v42 }
 0x18e   :  { %355 = vrot.lane.b32.xlu0 %v353_v44, %s1507_s14 }
 0x200   :  { %v356_v46 = vpop.permute.xlu0 %355 }
 0x201   :  { %v358_v47 = vadd.f32 %v356_v46, %v348_v45 }
 0x203   :  { %1389 = vtanh.f32 %v358_v47 }
 0x210   :  { %v1390_v48 = vpop.eup %1389 }
 0x211   :  { %361 = vrot.lane.b32.xlu1 %v1390_v48, %s1516_s28  ;;  %v248_v48 = vrot.slane %v1629_v35, %v1584_v10 }
 0x283   :  { %v362_v49 = vpop.permute.xlu1 %361 }
 0x284   :  { %v364_v50 = vmul.f32 %v362_v49, %v347_v42 }
 0x286   :  { %v372_v51 = vrot.slane %v364_v50, %v1584_v10 }
 0x288   :  { %373 = vrot.lane.b32.xlu1 %v372_v51, %s1507_s14 }
 0x2fa   :  { %v374_v52 = vpop.permute.xlu1 %373 }
 0x2fb   :  { %1296 = vmatmul.mubr.msk.f32.vlgmr.msra.gmra.mxu0 %vm270_vm2, %v374_v52 }
 0x2fc   :  { %1310 = vmatpush3.msra.mxu0 %v1582_v7  ;;  %1317 = vmatprep.mubr.msk.f32.mxu0 %vm1515_vm0, %v1513_v2 }
 0x2fd   :  { %1311 = vmatprep.subr.mxu0 %v1513_v2 }
 0x2fe   :  { %1312 = vmatpush3.msra.mxu0 %v1588_v16 }
 0x2ff   :  { %1313 = vmatprep.subr.mxu0 %v1513_v2 }
 0x300   :  { %1314 = vmatpush3.msra.mxu0 %v1591_v22 }
 0x301   :  { %1315 = vmatprep.subr.mxu0 %v1513_v2 }
 0x302   :  { %1316 = vmatpush3.msra.mxu0 %v1597_v26 }
 0x303   :  { %1331 = vmatprep.subr.mxu0 %v1513_v2 }
 0x3bb   :  { %v443_v54 = vpop.f32.mrf.mxu0 }
 0x3bc   :  { %v447_v55 = vadd.f32 %v443_v54, %v239_v53 }
 0x3bd   :  { %v1297_v56 = vpop.f32.mrf.mxu0 }
 0x3be   :  { %1391 = vtanh.f32 %v447_v55 }
 0x3cb   :  { %v1392_v57 = vpop.eup %1391 }
 0x3cc   :  { %453 = vrot.lane.b32.xlu0 %v1392_v57, %s1516_s28  ;;  %v449_v58 = vmul.f32 0.5, %v1392_v57 }
 0x3ce   :  { %v450_v59 = vadd.f32 0.5, %v449_v58 }
 0x3d0   :  { %v451_v62 = vmul.f32 %v450_v59, %v358_v47 }
 0x43e   :  { %v454_v60 = vpop.permute.xlu0 %453 }
 0x43f   :  { %v456_v61 = vmul.f32 %v454_v60, %v450_v59 }
 0x441   :  { %458 = vrot.lane.b32.xlu1 %v456_v61, %s1507_s14 }
 0x4b3   :  { %v459_v63 = vpop.permute.xlu1 %458 }
 0x4b4   :  { %v461_v0 = vadd.f32 %v459_v63, %v451_v62 }
 0x4b6   :  { %1393 = vtanh.f32 %v461_v0 }
 0x4c3   :  { %v1394_v1 = vpop.eup %1393 }
 0x4c4   :  { %464 = vrot.lane.b32.xlu0 %v1394_v1, %s1516_s28  ;;  %v256_v1 = vcombine.high %v248_v48, %v248_v48 }
 0x536   :  { %v465_v3 = vpop.permute.xlu0 %464 }
 0x537   :  { %v467_v4 = vmul.f32 %v465_v3, %v450_v59 }
 0x539   :  { %v475_v5 = vrot.slane %v467_v4, %v1584_v10 }
 0x53b   :  { %476 = vrot.lane.b32.xlu1 %v475_v5, %s1507_s14 }
 0x5ad   :  { %v477_v6 = vpop.permute.xlu1 %476 }
 0x5ae   :  { %1307 = vmatmul.mubr.msk.f32.vlgmr.msra.gmra.mxu1 %vm270_vm2, %v477_v6 }
 0x5af   :  { %1321 = vmatpush3.msra.mxu1 %v1582_v7  ;;  %1328 = vmatprep.mubr.msk.f32.mxu1 %vm1515_vm0, %v1513_v2 }
 0x5b0   :  { %1322 = vmatprep.subr.mxu1 %v1513_v2 }
 0x5b1   :  { %1323 = vmatpush3.msra.mxu1 %v1588_v16 }
 0x5b2   :  { %1324 = vmatprep.subr.mxu1 %v1513_v2 }
 0x5b3   :  { %1325 = vmatpush3.msra.mxu1 %v1591_v22 }
 0x5b4   :  { %1326 = vmatprep.subr.mxu1 %v1513_v2 }
 0x5b5   :  { %1327 = vmatpush3.msra.mxu1 %v1597_v26 }
 0x5b6   :  { %1342 = vmatprep.subr.mxu1 %v1513_v2 }
 0x66e   :  { %v546_v11 = vpop.f32.mrf.mxu1 }
 0x66f   :  { %v550_v12 = vadd.f32 %v546_v11, %v238_v9 }
 0x670   :  { %v1308_v13 = vpop.f32.mrf.mxu1 }
 0x671   :  { %1395 = vtanh.f32 %v550_v12 }
 0x67e   :  { %v1396_v14 = vpop.eup %1395 }
 0x67f   :  { %556 = vrot.lane.b32.xlu0 %v1396_v14, %s1516_s28  ;;  %v552_v15 = vmul.f32 0.5, %v1396_v14 }
 0x681   :  { %v553_v17 = vadd.f32 0.5, %v552_v15 }
 0x683   :  { %v554_v20 = vmul.f32 %v553_v17, %v461_v0 }
 0x6f1   :  { %v557_v18 = vpop.permute.xlu0 %556 }
 0x6f2   :  { %v559_v19 = vmul.f32 %v557_v18, %v553_v17  ;;  %v241_v18 = vcombine.high %v1629_v35, %v1629_v35 }
 0x6f4   :  { %561 = vrot.lane.b32.xlu1 %v559_v19, %s1507_s14  ;;  %v255_v19 = vrot.slane %v241_v18, %v1584_v10 }
 0x766   :  { %v562_v21 = vpop.permute.xlu1 %561 }
 0x767   :  { %v564_v23 = vadd.f32 %v562_v21, %v554_v20 }
 0x769   :  { %1397 = vtanh.f32 %v564_v23 }
 0x776   :  { %v1398_v24 = vpop.eup %1397 }
 0x777   :  { %567 = vrot.lane.b32.xlu0 %v1398_v24, %s1516_s28 }
 0x7e9   :  { %v568_v25 = vpop.permute.xlu0 %567 }
 0x7ea   :  { %v570_v27 = vmul.f32 %v568_v25, %v553_v17 }
 0x7ec   :  { %v578_v28 = vrot.slane %v570_v27, %v1584_v10 }
 0x7ee   :  { %579 = vrot.lane.b32.xlu1 %v578_v28, %s1507_s14 }
 0x860   :  { %v580_v29 = vpop.permute.xlu1 %579 }
 0x861   :  { %1318 = vmatmul.mubr.msk.f32.vlgmr.msra.gmra.mxu0 %vm270_vm2, %v580_v29 }
 0x862   :  { %1332 = vmatpush3.msra.mxu0 %v1582_v7  ;;  %1339 = vmatprep.mubr.msk.f32.mxu0 %vm1515_vm0, %v1513_v2 }
 0x863   :  { %1333 = vmatprep.subr.mxu0 %v1513_v2 }
 0x864   :  { %1334 = vmatpush3.msra.mxu0 %v1588_v16 }
 0x865   :  { %1335 = vmatprep.subr.mxu0 %v1513_v2 }
 0x866   :  { %1336 = vmatpush3.msra.mxu0 %v1591_v22 }
 0x867   :  { %1337 = vmatprep.subr.mxu0 %v1513_v2 }
 0x868   :  { %1338 = vmatpush3.msra.mxu0 %v1597_v26 }
 0x869   :  { %1353 = vmatprep.subr.mxu0 %v1513_v2 }
 0x921   :  { %v649_v31 = vpop.f32.mrf.mxu0 }
 0x922   :  { %v653_v32 = vadd.f32 %v649_v31, %v240_v30 }
 0x923   :  { %v1319_v33 = vpop.f32.mrf.mxu0 }
 0x924   :  { %1399 = vtanh.f32 %v653_v32 }
 0x931   :  { %v1400_v34 = vpop.eup %1399 }
 0x932   :  { %659 = vrot.lane.b32.xlu0 %v1400_v34, %s1516_s28  ;;  %v655_v36 = vmul.f32 0.5, %v1400_v34 }
 0x934   :  { %v656_v37 = vadd.f32 0.5, %v655_v36 }
 0x936   :  { %v657_v40 = vmul.f32 %v656_v37, %v564_v23 }
 0x9a4   :  { %v660_v38 = vpop.permute.xlu0 %659 }
 0x9a5   :  { %v662_v39 = vmul.f32 %v660_v38, %v656_v37  ;;  %v257_v38 = vcombine.high %v255_v19, %v255_v19 }
 0x9a7   :  { %664 = vrot.lane.b32.xlu1 %v662_v39, %s1507_s14 }
 0xa19   :  { %v665_v41 = vpop.permute.xlu1 %664 }
 0xa1a   :  { %v667_v42 = vadd.f32 %v665_v41, %v657_v40 }
 0xa1c   :  { %1401 = vtanh.f32 %v667_v42 }
 0xa29   :  { %v1402_v43 = vpop.eup %1401 }
 0xa2a   :  { %670 = vrot.lane.b32.xlu0 %v1402_v43, %s1516_s28 }
 0xa9c   :  { %v671_v44 = vpop.permute.xlu0 %670 }
 0xa9d   :  { %v673_v45 = vmul.f32 %v671_v44, %v656_v37 }
 0xa9f   :  { %v681_v46 = vrot.slane %v673_v45, %v1584_v10 }
 0xaa1   :  { %682 = vrot.lane.b32.xlu1 %v681_v46, %s1507_s14 }
 0xb13   :  { %v683_v47 = vpop.permute.xlu1 %682 }
 0xb14   :  { %1329 = vmatmul.mubr.msk.f32.vlgmr.msra.gmra.mxu1 %vm270_vm2, %v683_v47 }
 0xb15   :  { %1343 = vmatpush3.msra.mxu1 %v1582_v7  ;;  %1350 = vmatprep.mubr.msk.f32.mxu1 %vm1515_vm0, %v1513_v2 }
 0xb16   :  { %1344 = vmatprep.subr.mxu1 %v1513_v2 }
 0xb17   :  { %1345 = vmatpush3.msra.mxu1 %v1588_v16 }
 0xb18   :  { %1346 = vmatprep.subr.mxu1 %v1513_v2 }
 0xb19   :  { %1347 = vmatpush3.msra.mxu1 %v1591_v22 }
 0xb1a   :  { %1348 = vmatprep.subr.mxu1 %v1513_v2 }
 0xb1b   :  { %1349 = vmatpush3.msra.mxu1 %v1597_v26 }
 0xb1c   :  { %1364 = vmatprep.subr.mxu1 %v1513_v2 }
 0xbd4   :  { %v752_v49 = vpop.f32.mrf.mxu1 }
 0xbd5   :  { %v756_v50 = vadd.f32 %v752_v49, %v248_v48 }
 0xbd6   :  { %v1330_v51 = vpop.f32.mrf.mxu1 }
 0xbd7   :  { %1403 = vtanh.f32 %v756_v50  ;;  %v1089_v50 = vld [vmem:[#allocation8 + $0x18] sm:$0xff]  ;;  %v1088_v51 = vld [vmem:[#allocation8 + $0x10] sm:$0xff] }
 0xbe4   :  { %v1404_v52 = vpop.eup %1403 }
 0xbe5   :  { %762 = vrot.lane.b32.xlu0 %v1404_v52, %s1516_s28  ;;  %v758_v53 = vmul.f32 0.5, %v1404_v52  ;;  %v1087_v52 = vld [vmem:[#allocation8 + $0x8] sm:$0xff] }
 0xbe7   :  { %v759_v54 = vadd.f32 0.5, %v758_v53  ;;  %v1086_v53 = vld [vmem:[#allocation8] sm:$0xff] }
 0xbe9   :  { %v760_v57 = vmul.f32 %v759_v54, %v667_v42 }
 0xc57   :  { %v763_v55 = vpop.permute.xlu0 %762 }
 0xc58   :  { %v765_v56 = vmul.f32 %v763_v55, %v759_v54 }
 0xc5a   :  { %767 = vrot.lane.b32.xlu1 %v765_v56, %s1507_s14 }
 0xccc   :  { %v768_v58 = vpop.permute.xlu1 %767 }
 0xccd   :  { %v770_v59 = vadd.f32 %v768_v58, %v760_v57 }
 0xccf   :  { %1405 = vtanh.f32 %v770_v59 }
 0xcdc   :  { %v1406_v60 = vpop.eup %1405 }
 0xcdd   :  { %773 = vrot.lane.b32.xlu0 %v1406_v60, %s1516_s28 }
 0xd4f   :  { %v774_v61 = vpop.permute.xlu0 %773 }
 0xd50   :  { %v776_v62 = vmul.f32 %v774_v61, %v759_v54 }
 0xd52   :  { %v784_v63 = vrot.slane %v776_v62, %v1584_v10  ;;  %v1221_v62 = vld [vmem:[%s1760_s6] ss:$0 sm:$0xff] }
 0xd54   :  { %785 = vrot.lane.b32.xlu1 %v784_v63, %s1507_s14 }
 0xdc6   :  { %v786_v0 = vpop.permute.xlu1 %785 }
 0xdc7   :  { %1340 = vmatmul.mubr.msk.f32.vlgmr.msra.gmra.mxu0 %vm270_vm2, %v786_v0 }
 0xdc8   :  { %1354 = vmatpush3.msra.mxu0 %v1582_v7  ;;  %1361 = vmatprep.mubr.msk.f32.mxu0 %vm1515_vm0, %v1513_v2 }
 0xdc9   :  { %1355 = vmatprep.subr.mxu0 %v1513_v2 }
 0xdca   :  { %1356 = vmatpush3.msra.mxu0 %v1588_v16 }
 0xdcb   :  { %1357 = vmatprep.subr.mxu0 %v1513_v2 }
 0xdcc   :  { %1358 = vmatpush3.msra.mxu0 %v1591_v22 }
 0xdcd   :  { %1359 = vmatprep.subr.mxu0 %v1513_v2 }
 0xdce   :  { %1360 = vmatpush3.msra.mxu0 %v1597_v26 }
 0xe87   :  { %v855_v3 = vpop.f32.mrf.mxu0 }
 0xe88   :  { %v859_v4 = vadd.f32 %v855_v3, %v256_v1  ;;  %v1222_v1 = vld [vmem:[#allocation2] ss:$0 sm:$0xff] }
 0xe89   :  { %v1341_v5 = vpop.f32.mrf.mxu0 }
 0xe8a   :  { %1407 = vtanh.f32 %v859_v4 }
 0xe97   :  { %v1408_v7 = vpop.eup %1407 }
 0xe98   :  { %865 = vrot.lane.b32.xlu0 %v1408_v7, %s1516_s28  ;;  %v861_v6 = vmul.f32 0.5, %v1408_v7 }
 0xe9a   :  { %v862_v8 = vadd.f32 0.5, %v861_v6 }
 0xe9c   :  { %v863_v11 = vmul.f32 %v862_v8, %v770_v59  ;;  %v1219_v59 = vld [vmem:[%s1759_s5] ss:$0 sm:$0xff] }
 0xf0a   :  { %v866_v9 = vpop.permute.xlu0 %865 }
 0xf0b   :  { %v868_v16 = vmul.f32 %v866_v9, %v862_v8 }
 0xf0d   :  { %870 = vrot.lane.b32.xlu1 %v868_v16, %s1507_s14 }
 0xf7f   :  { %v871_v22 = vpop.permute.xlu1 %870 }
 0xf80   :  { %v873_v12 = vadd.f32 %v871_v22, %v863_v11 }
 0xf82   :  { %1409 = vtanh.f32 %v873_v12 }
 0xf8f   :  { %v1410_v13 = vpop.eup %1409 }
 0xf90   :  { %876 = vrot.lane.b32.xlu0 %v1410_v13, %s1516_s28 }
0x1002   :  { %v877_v26 = vpop.permute.xlu0 %876 }
0x1003   :  { %v879_v14 = vmul.f32 %v877_v26, %v862_v8 }
0x1005   :  { %v887_v15 = vrot.slane %v879_v14, %v1584_v10 }
0x1007   :  { %888 = vrot.lane.b32.xlu1 %v887_v15, %s1507_s14 }
0x1079   :  { %v889_v17 = vpop.permute.xlu1 %888 }
0x107a   :  { %1351 = vmatmul.mubr.msk.f32.vlgmr.msra.gmra.mxu1 %vm270_vm2, %v889_v17 }
0x107b   :  { %1372 = vmatprep.mubr.msk.f32.mxu1 %vm1515_vm0, %v1513_v2  ;;  %1365 = vmatpush3.msra.mxu1 %v1089_v50 }
0x107c   :  { %1366 = vmatprep.subr.mxu1 %v1513_v2 }
0x107d   :  { %1367 = vmatpush3.msra.mxu1 %v1088_v51 }
0x107e   :  { %1368 = vmatprep.subr.mxu1 %v1513_v2 }
0x107f   :  { %1369 = vmatpush3.msra.mxu1 %v1087_v52 }
0x1080   :  { %1370 = vmatprep.subr.mxu1 %v1513_v2 }
0x1081   :  { %1371 = vmatpush3.msra.mxu1 %v1086_v53 }
0x113a   :  { %v958_v20 = vpop.f32.mrf.mxu1 }
0x113b   :  { %v962_v21 = vadd.f32 %v958_v20, %v255_v19 }
0x113c   :  { %v1352_v23 = vpop.f32.mrf.mxu1 }
0x113d   :  { %1411 = vtanh.f32 %v962_v21 }
0x114a   :  { %v1412_v24 = vpop.eup %1411 }
0x114b   :  { %968 = vrot.lane.b32.xlu0 %v1412_v24, %s1516_s28  ;;  %v964_v25 = vmul.f32 0.5, %v1412_v24 }
0x114d   :  { %v965_v27 = vadd.f32 0.5, %v964_v25 }
0x114f   :  { %v966_v30 = vmul.f32 %v965_v27, %v873_v12 }
0x11bd   :  { %v969_v28 = vpop.permute.xlu0 %968 }
0x11be   :  { %v971_v29 = vmul.f32 %v969_v28, %v965_v27 }
0x11c0   :  { %973 = vrot.lane.b32.xlu1 %v971_v29, %s1507_s14 }
0x1232   :  { %v974_v31 = vpop.permute.xlu1 %973 }
0x1233   :  { %v976_v32 = vadd.f32 %v974_v31, %v966_v30 }
0x1235   :  { %1413 = vtanh.f32 %v976_v32 }
0x1242   :  { %v1414_v35 = vpop.eup %1413 }
0x1243   :  { %979 = vrot.lane.b32.xlu0 %v1414_v35, %s1516_s28 }
0x12b5   :  { %v980_v33 = vpop.permute.xlu0 %979 }
0x12b6   :  { %v982_v34 = vmul.f32 %v980_v33, %v965_v27 }
0x12b8   :  { %v990_v36 = vrot.slane %v982_v34, %v1584_v10 }
0x12ba   :  { %991 = vrot.lane.b32.xlu1 %v990_v36, %s1507_s14 }
0x132c   :  { %v992_v37 = vpop.permute.xlu1 %991 }
0x132d   :  { %1362 = vmatmul.mubr.msk.f32.vlgmr.msra.gmra.mxu0 %vm270_vm2, %v992_v37 }
0x13ed   :  { %v1061_v39 = vpop.f32.mrf.mxu0 }
0x13ee   :  { %v1065_v40 = vadd.f32 %v1061_v39, %v257_v38 }
0x13ef   :  { %v1363_v41 = vpop.f32.mrf.mxu0 }
0x13f0   :  { %1415 = vtanh.f32 %v1065_v40 }
0x13fd   :  { %v1416_v42 = vpop.eup %1415 }
0x13fe   :  { %1071 = vrot.lane.b32.xlu0 %v1416_v42, %s1516_s28  ;;  %v1067_v43 = vmul.f32 0.5, %v1416_v42 }
0x1400   :  { %v1068_v44 = vadd.f32 0.5, %v1067_v43 }
0x1402   :  { %v1069_v47 = vmul.f32 %v1068_v44, %v976_v32 }
0x1470   :  { %v1072_v45 = vpop.permute.xlu0 %1071 }
0x1471   :  { %v1074_v46 = vmul.f32 %v1072_v45, %v1068_v44 }
0x1473   :  { %1076 = vrot.lane.b32.xlu1 %v1074_v46, %s1507_s14 }
0x14e5   :  { %v1077_v48 = vpop.permute.xlu1 %1076 }
0x14e6   :  { %v1079_v49 = vadd.f32 %v1077_v48, %v1069_v47 }
0x14e8   :  { %1417 = vtanh.f32 %v1079_v49 }
0x14f5   :  { %v1418_v54 = vpop.eup %1417 }
0x14f6   :  { %1082 = vrot.lane.b32.xlu0 %v1418_v54, %s1516_s28 }
0x1568   :  { %v1083_v55 = vpop.permute.xlu0 %1082 }
0x1569   :  { %v1085_v56 = vmul.f32 %v1083_v55, %v1068_v44 }
0x156b   :  { %v1104_v57 = vrot.slane %v1085_v56, %v1584_v10 }
0x156d   :  { %1105 = vrot.lane.b32.xlu1 %v1104_v57, %s1507_s14 }
0x15df   :  { %v1106_v58 = vpop.permute.xlu1 %1105 }
0x15e0   :  { %1373 = vmatmul.mubr.msk.f32.vlgmr.msra.gmra.mxu1 %vm270_vm2, %v1106_v58 }
0x16a0   :  { %v1175_v60 = vpop.f32.mrf.mxu1 }
0x16a1   :  { %v1176_v61 = vadd.f32 %v1219_v59, %v1175_v60 }
0x16a2   :  { %v1374_v2 = vpop.f32.mrf.mxu1 }
0x16a3   :  { %v1179_v63 = vmax.f32 %v1176_v61, 0.0 }
0x16a5   :  { %v1187_v0 = vmul.f32 %v1221_v62, %v1179_v63 }
0x16a7   :  { %v1189_v10 = vsel %vm1188_vm3, %v1187_v0, 0.0 }
0x16a8   :  { %1190 = vadd.xlane.f32.xlu0 %v1189_v10 }
0x1731   :  { %v1191_v3 = vpop.xlane.xlu0 %1190 }
0x1732   :  { %v1199_v4 = vadd.f32 %v1222_v1, %v1191_v3 }
0x1734   :  { %1201 = vst.msk [vmem:[%s1762_s8] sm:$0x3] %vm1200_vm4, %v1199_v4 }
0x1735   :  { %1206 = vsyncpa [#allocation4], 1 }
0x1736   :  { %1207 = vsyncpa [#allocation6], 1 }
0x1737   :  { %1208 = vsyncpa [#allocation9], 1 }

</bundles_post_ra>
